<compile_context>
chip_gen: v7x
topology: tpu7x:2x2x1
jax: 0.10.0
libtpu: 0.0.40
codegen_flags: <defaults>
</compile_context>

<pallas_src>
import functools

import jax
import jax.numpy as jnp
from jax.experimental import pallas as pl
from jax.experimental.pallas import tpu as pltpu

EPS = 1e-5
LANES = 128
VEC_ROWS = 8  # b1, g1, be1, b2, g2, be2, b3, <unused>


def _round8(n):
    return -(-n // 8) * 8


def make_layout(vocab_size, embedding_size, nums_hidden1, nums_hidden2):
    """Static packed-parameter layout: (offset, rows) per region, all x128 lanes.

    Regions are trimmed to the next multiple of 8 rows (sublane granularity)
    instead of full 128-row tiles, roughly halving the parameter DMA.
    All offsets stay multiples of 8, so every in-kernel slice is sublane
    aligned.
    """
    t_rows = _round8(vocab_size)
    w1_rows = _round8(embedding_size)
    w2_rows = _round8(nums_hidden1)
    w3_rows = _round8(nums_hidden2)
    t_off = 0
    w1_off = t_off + t_rows
    w2_off = w1_off + w1_rows
    w3_off = w2_off + w2_rows
    vec_off = w3_off + w3_rows
    total_rows = vec_off + VEC_ROWS
    return (t_off, t_rows, w1_off, w1_rows, w2_off, w2_rows,
            w3_off, w3_rows, vec_off, total_rows)


def dense_network2_kernel(ids_ref, p_ref, out_ref, *, layout):
    (t_off, t_rows, w1_off, w1_rows, w2_off, w2_rows,
     w3_off, w3_rows, vec_off, _) = layout
    B, S = ids_ref.shape
    ids = ids_ref[...]                                         # (B, S) int32

    # Small per-feature vectors: one vreg worth of rows (padding lanes are 0).
    vec = p_ref[vec_off:vec_off + VEC_ROWS, :]                 # (8, 128)
    b1, g1, be1 = vec[0:1, :], vec[1:2, :], vec[2:3, :]
    b2, g2, be2 = vec[3:4, :], vec[4:5, :], vec[5:6, :]
    b3 = vec[6:7, :]

    # --- embedding lookup + AvgPool(mean over S) fused as counts @ table ---
    #   counts[b, v] = #{s : ids[b, s] == v}
    #   pooled       = counts @ (table / S)    (1/S folded in at pack time)
    # NOTE: token ids outside [0, vocab_size) silently map to a zero
    # embedding (a real nn.Embedding gather would fail instead).
    vocab_iota = jax.lax.broadcasted_iota(jnp.int32, (B, S, t_rows), 2)
    counts = jnp.sum((ids[:, :, None] == vocab_iota).astype(jnp.float32),
                     axis=1)                                   # (B, t_rows)
    table = p_ref[t_off:t_off + t_rows, :]                     # load just before dot
    pooled = jnp.dot(counts, table,
                     preferred_element_type=jnp.float32)       # (B, 128)

    # --- Linear(E, H1) + ReLU + BatchNorm1d (training mode, biased var) ---
    w1 = p_ref[w1_off:w1_off + w1_rows, :]
    h1 = jnp.dot(pooled[:, :w1_rows], w1,
                 preferred_element_type=jnp.float32) + b1
    h1 = jnp.maximum(h1, 0.0)
    mu1 = jnp.mean(h1, axis=0, keepdims=True)
    var1 = jnp.mean((h1 - mu1) ** 2, axis=0, keepdims=True)
    h1 = (h1 - mu1) * jax.lax.rsqrt(var1 + EPS) * g1 + be1

    # --- Linear(H1, H2) + ReLU + BatchNorm1d ---
    w2 = p_ref[w2_off:w2_off + w2_rows, :]
    h2 = jnp.dot(h1[:, :w2_rows], w2,
                 preferred_element_type=jnp.float32) + b2
    h2 = jnp.maximum(h2, 0.0)
    mu2 = jnp.mean(h2, axis=0, keepdims=True)
    var2 = jnp.mean((h2 - mu2) ** 2, axis=0, keepdims=True)
    h2 = (h2 - mu2) * jax.lax.rsqrt(var2 + EPS) * g2 + be2

    # --- Linear(H2, num_classes), lane-dense (B, 128) store ---
    w3 = p_ref[w3_off:w3_off + w3_rows, :]
    out = jnp.dot(h2[:, :w3_rows], w3,
                  preferred_element_type=jnp.float32) + b3
    out_ref[...] = out.astype(out_ref.dtype)


def pack_params(params, seq_len, layout):
    """Pack all parameters into one trimmed, lane-padded f32 buffer.

    Called ONCE at init / param update (not inside the forward path).
    The 1/seq_len pooling scale is folded into the embedding-table rows.
    """
    (t_off, t_rows, w1_off, w1_rows, w2_off, w2_rows,
     w3_off, w3_rows, vec_off, total_rows) = layout
    emb = params["embeddings"].astype(jnp.float32)
    V, E = emb.shape
    H1 = params["w1"].shape[1]
    H2 = params["w2"].shape[1]
    C = params["w3"].shape[1]
    assert V <= t_rows and E <= w1_rows and H1 <= w2_rows and H2 <= w3_rows
    assert max(E, H1, H2, C) <= LANES

    packed = jnp.zeros((total_rows, LANES), jnp.float32)
    packed = packed.at[t_off:t_off + V, :E].set(emb * (1.0 / seq_len))
    packed = packed.at[w1_off:w1_off + E, :H1].set(params["w1"])
    packed = packed.at[w2_off:w2_off + H1, :H2].set(params["w2"])
    packed = packed.at[w3_off:w3_off + H2, :C].set(params["w3"])
    packed = packed.at[vec_off + 0, :H1].set(params["b1"][0])
    packed = packed.at[vec_off + 1, :H1].set(params["g1"][0])
    packed = packed.at[vec_off + 2, :H1].set(params["be1"][0])
    packed = packed.at[vec_off + 3, :H2].set(params["b2"][0])
    packed = packed.at[vec_off + 4, :H2].set(params["g2"][0])
    packed = packed.at[vec_off + 5, :H2].set(params["be2"][0])
    packed = packed.at[vec_off + 6, :C].set(params["b3"][0])
    return packed


@functools.partial(jax.jit, static_argnames=("layout", "num_classes"))
def dense_network2_forward(ids, packed, *, layout, num_classes):
    """ids: (B, S) int32 token ids; packed: pre-packed parameter buffer.

    Returns (B, num_classes) float32 logits.
    """
    B, _ = ids.shape
    t_rows, w1_rows, w2_rows, w3_rows = layout[1], layout[3], layout[5], layout[7]
    vmem = pl.BlockSpec(memory_space=pltpu.MemorySpace.VMEM)
    flops = 2 * B * LANES * (t_rows + w1_rows + w2_rows + w3_rows)
    bytes_accessed = ids.size * 4 + packed.size * 4 + B * LANES * 4

    out_full = pl.pallas_call(
        functools.partial(dense_network2_kernel, layout=layout),
        out_shape=jax.ShapeDtypeStruct((B, LANES), jnp.float32),
        in_specs=[vmem, vmem],
        out_specs=vmem,
        cost_estimate=pl.CostEstimate(flops=flops,
                                      transcendentals=2 * LANES,   # two rsqrt
                                      bytes_accessed=bytes_accessed),
    )(ids, packed)
    # Lane-dense kernel output; real logits live in the first num_classes lanes.
    return out_full[:, :num_classes]


def init_params(key, vocab_size=50, embedding_size=100,
                nums_hidden1=32, nums_hidden2=64, nums_classes=4):
    ks = jax.random.split(key, 8)
    embeddings = jax.random.normal(ks[0], (vocab_size, embedding_size),
                                   dtype=jnp.float32)
    # Linear weights: nn.init.normal_(w, 0, 0.01), stored as (in, out).
    w1 = 0.01 * jax.random.normal(ks[1], (embedding_size, nums_hidden1), jnp.float32)
    w2 = 0.01 * jax.random.normal(ks[2], (nums_hidden1, nums_hidden2), jnp.float32)
    w3 = 0.01 * jax.random.normal(ks[3], (nums_hidden2, nums_classes), jnp.float32)
    # Linear biases: PyTorch default uniform(-1/sqrt(fan_in), +1/sqrt(fan_in)).
    b1 = jax.random.uniform(ks[4], (1, nums_hidden1), jnp.float32,
                            -1.0 / embedding_size ** 0.5, 1.0 / embedding_size ** 0.5)
    b2 = jax.random.uniform(ks[5], (1, nums_hidden2), jnp.float32,
                            -1.0 / nums_hidden1 ** 0.5, 1.0 / nums_hidden1 ** 0.5)
    b3 = jax.random.uniform(ks[6], (1, nums_classes), jnp.float32,
                            -1.0 / nums_hidden2 ** 0.5, 1.0 / nums_hidden2 ** 0.5)
    # BatchNorm affine params: weight=1, bias=0.
    g1 = jnp.ones((1, nums_hidden1), jnp.float32)
    be1 = jnp.zeros((1, nums_hidden1), jnp.float32)
    g2 = jnp.ones((1, nums_hidden2), jnp.float32)
    be2 = jnp.zeros((1, nums_hidden2), jnp.float32)
    return dict(embeddings=embeddings,
                w1=w1, b1=b1, g1=g1, be1=be1,
                w2=w2, b2=b2, g2=g2, be2=be2,
                w3=w3, b3=b3)


def reference_forward(x, params):
    """Pure-JAX reference mirroring the PyTorch forward (training-mode BN)."""
    emb = jnp.take(params["embeddings"], x, axis=0).astype(jnp.float32)
    pooled = jnp.mean(emb, axis=1)
    h1 = jnp.maximum(pooled @ params["w1"] + params["b1"], 0.0)
    mu1 = h1.mean(0, keepdims=True); v1 = ((h1 - mu1) ** 2).mean(0, keepdims=True)
    h1 = (h1 - mu1) / jnp.sqrt(v1 + EPS) * params["g1"] + params["be1"]
    h2 = jnp.maximum(h1 @ params["w2"] + params["b2"], 0.0)
    mu2 = h2.mean(0, keepdims=True); v2 = ((h2 - mu2) ** 2).mean(0, keepdims=True)
    h2 = (h2 - mu2) / jnp.sqrt(v2 + EPS) * params["g2"] + params["be2"]
    return h2 @ params["w3"] + params["b3"]


if __name__ == "__main__":
    key = jax.random.PRNGKey(0)
    pkey, xkey = jax.random.split(key)

    vocab_size, embedding_size = 50, 100
    nums_hidden1, nums_hidden2, nums_classes = 32, 64, 4
    batch, seq = 8, 8

    params = init_params(pkey, vocab_size, embedding_size,
                         nums_hidden1, nums_hidden2, nums_classes)
    x = jax.random.randint(xkey, (batch, seq), 0, vocab_size, dtype=jnp.int32)

    # Pack once at init; the jitted forward only ever sees the packed buffer.
    layout = make_layout(vocab_size, embedding_size, nums_hidden1, nums_hidden2)
    packed = jax.block_until_ready(pack_params(params, seq, layout))

    out = dense_network2_forward(x, packed, layout=layout,
                                 num_classes=nums_classes)
    out = jax.block_until_ready(out)

    ref = reference_forward(x, params)
    assert out.shape == (batch, nums_classes), out.shape
    assert jnp.allclose(out, ref, atol=1e-4, rtol=1e-4), "mismatch vs reference"

    print("KERNEL_OK")
</pallas_src>

<mosaic_0001>
module attributes {stable_mosaic.version = 11 : i64} {
  func.func @dense_network2_kernel(%arg0: memref<8x8xi32, #tpu.memory_space<vmem>>, %arg1: memref<264x128xf32, #tpu.memory_space<vmem>>, %arg2: memref<8x128xf32, #tpu.memory_space<vmem>>) attributes {dimension_semantics = [], scalar_prefetch = 0 : i64, scratch_operands = 0 : i64, tpu.core_type = #tpu.core_type<tc>} {
    %c0 = arith.constant 0 : index
    %c0_0 = arith.constant 0 : index
    %0 = vector.load %arg0[%c0, %c0_0] : memref<8x8xi32, #tpu.memory_space<vmem>>, vector<8x8xi32>
    %c256 = arith.constant 256 : index
    %c0_1 = arith.constant 0 : index
    %1 = vector.load %arg1[%c256, %c0_1] : memref<264x128xf32, #tpu.memory_space<vmem>>, vector<8x128xf32>
    %2 = vector.extract_strided_slice %1 {offsets = [0, 0], sizes = [1, 128], strides = [1, 1]} : vector<8x128xf32> to vector<1x128xf32>
    %3 = vector.extract_strided_slice %1 {offsets = [1, 0], sizes = [1, 128], strides = [1, 1]} : vector<8x128xf32> to vector<1x128xf32>
    %4 = vector.extract_strided_slice %1 {offsets = [2, 0], sizes = [1, 128], strides = [1, 1]} : vector<8x128xf32> to vector<1x128xf32>
    %5 = vector.extract_strided_slice %1 {offsets = [3, 0], sizes = [1, 128], strides = [1, 1]} : vector<8x128xf32> to vector<1x128xf32>
    %6 = vector.extract_strided_slice %1 {offsets = [4, 0], sizes = [1, 128], strides = [1, 1]} : vector<8x128xf32> to vector<1x128xf32>
    %7 = vector.extract_strided_slice %1 {offsets = [5, 0], sizes = [1, 128], strides = [1, 1]} : vector<8x128xf32> to vector<1x128xf32>
    %8 = vector.extract_strided_slice %1 {offsets = [6, 0], sizes = [1, 128], strides = [1, 1]} : vector<8x128xf32> to vector<1x128xf32>
    %9 = tpu.iota {dimensions = array<i32: 2>} : vector<8x8x56xi32>
    %10 = vector.shape_cast %0 : vector<8x8xi32> to vector<8x8x1xi32>
    %11 = vector.broadcast %10 : vector<8x8x1xi32> to vector<8x8x56xi32>
    %12 = arith.cmpi eq, %11, %9 : vector<8x8x56xi32>
    %13 = arith.extui %12 : vector<8x8x56xi1> to vector<8x8x56xi32>
    %14 = arith.sitofp %13 : vector<8x8x56xi32> to vector<8x8x56xf32>
    %cst = arith.constant dense<0.000000e+00> : vector<8x56xf32>
    %15 = vector.multi_reduction <add>, %14, %cst [1] : vector<8x8x56xf32> to vector<8x56xf32>
    %c0_2 = arith.constant 0 : index
    %c0_3 = arith.constant 0 : index
    %16 = vector.load %arg1[%c0_2, %c0_3] : memref<264x128xf32, #tpu.memory_space<vmem>>, vector<56x128xf32>
    %cst_4 = arith.constant dense<0.000000e+00> : vector<8x128xf32>
    %17 = tpu.matmul %15, %16, %cst_4 {dimension_numbers = #tpu.dot_dimension_numbers<[1], [0], [0], [1], [0, 0, 1, 1], [], []>} : vector<8x56xf32>, vector<56x128xf32>, vector<8x128xf32> -> vector<8x128xf32>
    %c56 = arith.constant 56 : index
    %c0_5 = arith.constant 0 : index
    %18 = vector.load %arg1[%c56, %c0_5] : memref<264x128xf32, #tpu.memory_space<vmem>>, vector<104x128xf32>
    %19 = vector.extract_strided_slice %17 {offsets = [0, 0], sizes = [8, 104], strides = [1, 1]} : vector<8x128xf32> to vector<8x104xf32>
    %cst_6 = arith.constant dense<0.000000e+00> : vector<8x128xf32>
    %20 = tpu.matmul %19, %18, %cst_6 {dimension_numbers = #tpu.dot_dimension_numbers<[1], [0], [0], [1], [0, 0, 1, 1], [], []>} : vector<8x104xf32>, vector<104x128xf32>, vector<8x128xf32> -> vector<8x128xf32>
    %21 = vector.broadcast %2 : vector<1x128xf32> to vector<8x128xf32>
    %22 = arith.addf %20, %21 : vector<8x128xf32>
    %cst_7 = arith.constant 0.000000e+00 : f32
    %23 = vector.broadcast %cst_7 : f32 to vector<8x128xf32>
    %24 = arith.maximumf %22, %23 : vector<8x128xf32>
    %cst_8 = arith.constant dense<0.000000e+00> : vector<128xf32>
    %25 = vector.multi_reduction <add>, %24, %cst_8 [0] : vector<8x128xf32> to vector<128xf32>
    %26 = vector.shape_cast %25 : vector<128xf32> to vector<1x128xf32>
    %cst_9 = arith.constant 8.000000e+00 : f32
    %27 = vector.broadcast %cst_9 : f32 to vector<1x128xf32>
    %28 = arith.divf %26, %27 : vector<1x128xf32>
    %29 = vector.broadcast %28 : vector<1x128xf32> to vector<8x128xf32>
    %30 = arith.subf %24, %29 : vector<8x128xf32>
    %31 = arith.mulf %30, %30 : vector<8x128xf32>
    %cst_10 = arith.constant dense<0.000000e+00> : vector<128xf32>
    %32 = vector.multi_reduction <add>, %31, %cst_10 [0] : vector<8x128xf32> to vector<128xf32>
    %33 = vector.shape_cast %32 : vector<128xf32> to vector<1x128xf32>
    %cst_11 = arith.constant 8.000000e+00 : f32
    %34 = vector.broadcast %cst_11 : f32 to vector<1x128xf32>
    %35 = arith.divf %33, %34 : vector<1x128xf32>
    %36 = vector.broadcast %28 : vector<1x128xf32> to vector<8x128xf32>
    %37 = arith.subf %24, %36 : vector<8x128xf32>
    %cst_12 = arith.constant 9.99999974E-6 : f32
    %38 = vector.broadcast %cst_12 : f32 to vector<1x128xf32>
    %39 = arith.addf %35, %38 : vector<1x128xf32>
    %40 = math.rsqrt %39 : vector<1x128xf32>
    %41 = vector.broadcast %40 : vector<1x128xf32> to vector<8x128xf32>
    %42 = arith.mulf %37, %41 : vector<8x128xf32>
    %43 = vector.broadcast %3 : vector<1x128xf32> to vector<8x128xf32>
    %44 = arith.mulf %42, %43 : vector<8x128xf32>
    %45 = vector.broadcast %4 : vector<1x128xf32> to vector<8x128xf32>
    %46 = arith.addf %44, %45 : vector<8x128xf32>
    %c160 = arith.constant 160 : index
    %c0_13 = arith.constant 0 : index
    %47 = vector.load %arg1[%c160, %c0_13] : memref<264x128xf32, #tpu.memory_space<vmem>>, vector<32x128xf32>
    %48 = vector.extract_strided_slice %46 {offsets = [0, 0], sizes = [8, 32], strides = [1, 1]} : vector<8x128xf32> to vector<8x32xf32>
    %cst_14 = arith.constant dense<0.000000e+00> : vector<8x128xf32>
    %49 = tpu.matmul %48, %47, %cst_14 {dimension_numbers = #tpu.dot_dimension_numbers<[1], [0], [0], [1], [0, 0, 1, 1], [], []>} : vector<8x32xf32>, vector<32x128xf32>, vector<8x128xf32> -> vector<8x128xf32>
    %50 = vector.broadcast %5 : vector<1x128xf32> to vector<8x128xf32>
    %51 = arith.addf %49, %50 : vector<8x128xf32>
    %cst_15 = arith.constant 0.000000e+00 : f32
    %52 = vector.broadcast %cst_15 : f32 to vector<8x128xf32>
    %53 = arith.maximumf %51, %52 : vector<8x128xf32>
    %cst_16 = arith.constant dense<0.000000e+00> : vector<128xf32>
    %54 = vector.multi_reduction <add>, %53, %cst_16 [0] : vector<8x128xf32> to vector<128xf32>
    %55 = vector.shape_cast %54 : vector<128xf32> to vector<1x128xf32>
    %cst_17 = arith.constant 8.000000e+00 : f32
    %56 = vector.broadcast %cst_17 : f32 to vector<1x128xf32>
    %57 = arith.divf %55, %56 : vector<1x128xf32>
    %58 = vector.broadcast %57 : vector<1x128xf32> to vector<8x128xf32>
    %59 = arith.subf %53, %58 : vector<8x128xf32>
    %60 = arith.mulf %59, %59 : vector<8x128xf32>
    %cst_18 = arith.constant dense<0.000000e+00> : vector<128xf32>
    %61 = vector.multi_reduction <add>, %60, %cst_18 [0] : vector<8x128xf32> to vector<128xf32>
    %62 = vector.shape_cast %61 : vector<128xf32> to vector<1x128xf32>
    %cst_19 = arith.constant 8.000000e+00 : f32
    %63 = vector.broadcast %cst_19 : f32 to vector<1x128xf32>
    %64 = arith.divf %62, %63 : vector<1x128xf32>
    %65 = vector.broadcast %57 : vector<1x128xf32> to vector<8x128xf32>
    %66 = arith.subf %53, %65 : vector<8x128xf32>
    %cst_20 = arith.constant 9.99999974E-6 : f32
    %67 = vector.broadcast %cst_20 : f32 to vector<1x128xf32>
    %68 = arith.addf %64, %67 : vector<1x128xf32>
    %69 = math.rsqrt %68 : vector<1x128xf32>
    %70 = vector.broadcast %69 : vector<1x128xf32> to vector<8x128xf32>
    %71 = arith.mulf %66, %70 : vector<8x128xf32>
    %72 = vector.broadcast %6 : vector<1x128xf32> to vector<8x128xf32>
    %73 = arith.mulf %71, %72 : vector<8x128xf32>
    %74 = vector.broadcast %7 : vector<1x128xf32> to vector<8x128xf32>
    %75 = arith.addf %73, %74 : vector<8x128xf32>
    %c192 = arith.constant 192 : index
    %c0_21 = arith.constant 0 : index
    %76 = vector.load %arg1[%c192, %c0_21] : memref<264x128xf32, #tpu.memory_space<vmem>>, vector<64x128xf32>
    %77 = vector.extract_strided_slice %75 {offsets = [0, 0], sizes = [8, 64], strides = [1, 1]} : vector<8x128xf32> to vector<8x64xf32>
    %cst_22 = arith.constant dense<0.000000e+00> : vector<8x128xf32>
    %78 = tpu.matmul %77, %76, %cst_22 {dimension_numbers = #tpu.dot_dimension_numbers<[1], [0], [0], [1], [0, 0, 1, 1], [], []>} : vector<8x64xf32>, vector<64x128xf32>, vector<8x128xf32> -> vector<8x128xf32>
    %79 = vector.broadcast %8 : vector<1x128xf32> to vector<8x128xf32>
    %80 = arith.addf %78, %79 : vector<8x128xf32>
    %c0_23 = arith.constant 0 : index
    %c0_24 = arith.constant 0 : index
    %81 = vector.load %arg2[%c0_23, %c0_24] : memref<8x128xf32, #tpu.memory_space<vmem>>, vector<8x128xf32>
    tpu.vector_store %arg2[%c0_23, %c0_24], %80 {strides = array<i32>} : memref<8x128xf32, #tpu.memory_space<vmem>>, vector<8x128xf32>,
    return
  }
}

</mosaic_0001>

<bundles_post_ra>
// kernel: dense_network2_forward.1
= control target key start
LH: loop header
LB: loop body
LE: loop exit
PB: predicated region body
PF: predicated region fallthrough
CT: control target
= control target key end

     0   :  { %7 = vsyncpa [#allocation3], 0  ;;  %s983_s0 = inlined_call_operand.hbm [shape: s32[8,8], index: 0, kind: input, shape index: {}]   ;;  %s984_s1 = inlined_call_operand.hbm [shape: f32[264,128], index: 1, kind: input, shape index: {}]   ;;  %s985_s2 = inlined_call_operand.vmem [shape: f32[8,128], index: 2, kind: output, shape index: {}]  }
   0x1   :  { %8 = vsyncpa [#allocation5], 0  ;;  %s834_s9 = smov [#allocation2]   ;;  %s835_s11 = smov [#allocation4]  }
   0x2   :  { %s15_s10 = sshll.u32 %s834_s9, 4  ;;  %s24_s12 = sshll.u32 %s835_s11, 4  ;;  %s16_s10 = int_to_ptr.vmem [resolvable:$true] %s15_s10  ;;  %s856_s12 = int_to_ptr.vmem [resolvable:$true] %s24_s12 }
   0x3   :  { %s786_s15 = scalar_lea.hbm %s983_s0, 128 }
   0x4   :  { %p787_p0 = scmp.ne.s32.totalorder %s983_s0, %s786_s15  ;;  %p790_p1 = scmp.lt.u32.totalorder %s786_s15, %s983_s0 }
   0x6   :  { %p792_p2 = pnand %p790_p1, %p787_p0 }
   0x8   :  { %795 = shalt.err (!%p792_p2)
}
   0x9   :  { %s796_s20 = scalar_lea.vmem %s16_s10, 128  ;;  %p801_p4 = scmp.lt.s32.totalorder %s16_s10, %s16_s10 }
   0xa   :  { %p797_p3 = scmp.ne.s32.totalorder %s16_s10, %s796_s20  ;;  %p802_p5 = scmp.lt.s32.totalorder %s796_s20, %s796_s20 }
   0xc   :  { %p803_p6 = por %p802_p5, %p801_p4 }
   0xe   :  { %p804_p7 = pnand %p803_p6, %p797_p3 }
  0x10   :  { %807 = shalt.err (!%p804_p7)
}
  0x11   :  { %18 = dma.hbm_to_vmem [thread:$0]  %s983_s0, 128, %s16_s10, [#allocation3]  }
  0x12   :  { %s808_s25 = scalar_lea.hbm %s984_s1, 4224 }
  0x13   :  { %p809_p8 = scmp.ne.s32.totalorder %s984_s1, %s808_s25  ;;  %p812_p9 = scmp.lt.u32.totalorder %s808_s25, %s984_s1 }
  0x15   :  { %p814_p10 = pnand %p812_p9, %p809_p8 }
  0x17   :  { %817 = shalt.err (!%p814_p10)
}
  0x18   :  { %s818_s30 = scalar_lea.vmem %s856_s12, 4224  ;;  %p823_p12 = scmp.lt.s32.totalorder %s856_s12, %s856_s12 }
  0x19   :  { %p819_p11 = scmp.ne.s32.totalorder %s856_s12, %s818_s30  ;;  %p824_p13 = scmp.lt.s32.totalorder %s818_s30, %s818_s30 }
  0x1b   :  { %p825_p0 = por %p824_p13, %p823_p12 }
  0x1d   :  { %p826_p1 = pnand %p825_p0, %p819_p11 }
  0x1f   :  { %829 = shalt.err (!%p826_p1)
}
  0x20   :  { %s836_s0 = smov 128   ;;  %s837_s3 = smov 8  }
  0x21   :  { %30 = dma.hbm_to_vmem [thread:$0]  %s984_s1, 4224, %s856_s12, [#allocation5], %s836_s0, %s836_s0, %s837_s3  }
  0x22   :  { %830 = dma.done.wait [#allocation3], 128  }
  0x23   :  { %831 = vsyncadd [#allocation3], 4294967168 }
  0x24   :  { %832 = dma.done.wait [#allocation5], 4224  }
  0x25   :  { %833 = vsyncadd [#allocation5], 4294963072  ;;  %v39_v0 = vlaneseq  ;;  %v37_v6 = vld [vmem:[#allocation2] sm:$0xff]  ;;  %v178_v15 = vld [vmem:[#allocation4] sm:$0xff]  ;;  %v838_v20 = vmov 0.0|0.0   ;;  %v839_v29 = vmov 0.0  }
  0x26   :  { %v179_v16 = vld [vmem:[#allocation4 + $0x8] sm:$0xff]  ;;  %730 = vmatprep.subr.bf16.mxu0 %v838_v20  ;;  %739 = vmatprep.subr.bf16.mxu1 %v838_v20  ;;  %v180_v21 = vld [vmem:[#allocation4 + $0x10] sm:$0xff]  ;;  %v181_v22 = vld [vmem:[#allocation4 + $0x18] sm:$0xff]  ;;  %vm840_vm0 = vmmov 0   ;;  %vm121_vm1 = vcmask 457728   ;;  %vm193_vm8 = vcmask 1041409  }
  0x27   :  { %v888_v1 = vshrl.u32 %v39_v0, 7  ;;  %v731_v19 = vpack.c.bf16 %v179_v16, %v178_v15  ;;  %v734_v25 = vpack.c.bf16 %v181_v22, %v180_v21  ;;  %v182_v26 = vld [vmem:[#allocation4 + $0x20] sm:$0xff]  ;;  %v183_v27 = vld [vmem:[#allocation4 + $0x28] sm:$0xff]  ;;  %v184_v30 = vld [vmem:[#allocation4 + $0x30] sm:$0xff]  ;;  %668 = vmatprep.mubr.msk.f32.mxu0 %vm840_vm0, %v839_v29  ;;  %697 = vmatprep.mubr.msk.f32.mxu1 %vm840_vm0, %v839_v29  ;;  %v40_v49 = vand.u32 127, %v39_v0 }
  0x28   :  { %v737_v28 = vpack.c.bf16 %v183_v27, %v182_v26  ;;  %v279_v31 = vld [vmem:[#allocation4 + $0x38] sm:$0xff]  ;;  %v280_v32 = vld [vmem:[#allocation4 + $0x40] sm:$0xff]  ;;  %v281_v33 = vld [vmem:[#allocation4 + $0x48] sm:$0xff]  ;;  %vm195_vm11 = vcmask 1042434   ;;  %vm197_vm12 = vcmask 1043459   ;;  %vm199_vm13 = vcmask 1044484  }
  0x29   :  { %v57_v2 = vsub.s32 2, %v888_v1  ;;  %v43_v3 = vsub.s32 0, %v888_v1  ;;  %v64_v4 = vsub.s32 3, %v888_v1  ;;  %v50_v5 = vsub.s32 1, %v888_v1  ;;  %732 = vmatpush3.bf16.msra.mxu0 %v731_v19  ;;  %v282_v35 = vld [vmem:[#allocation4 + $0x50] sm:$0xff]  ;;  %v283_v37 = vld [vmem:[#allocation4 + $0x58] sm:$0xff] }
  0x2a   :  { %v78_v11 = vsub.s32 5, %v888_v1  ;;  %v71_v12 = vsub.s32 4, %v888_v1  ;;  %v92_v13 = vsub.s32 7, %v888_v1  ;;  %v85_v14 = vsub.s32 6, %v888_v1  ;;  %733 = vmatprep.subr.bf16.mxu0 %v838_v20  ;;  %v284_v38 = vld [vmem:[#allocation4 + $0x60] sm:$0xff]  ;;  %v285_v40 = vld [vmem:[#allocation4 + $0x68] sm:$0xff] }
  0x2b   :  { %v58_v7 = vrot.slane %v37_v6, %v57_v2  ;;  %v44_v8 = vrot.slane %v37_v6, %v43_v3  ;;  %v65_v9 = vrot.slane %v37_v6, %v64_v4  ;;  %v51_v10 = vrot.slane %v37_v6, %v50_v5  ;;  %v286_v41 = vld [vmem:[#allocation4 + $0x70] sm:$0xff]  ;;  %v287_v43 = vld [vmem:[#allocation4 + $0x78] sm:$0xff]  ;;  %v288_v44 = vld [vmem:[#allocation4 + $0x80] sm:$0xff] }
  0x2c   :  { %v79_v17 = vrot.slane %v37_v6, %v78_v11  ;;  %v72_v18 = vrot.slane %v37_v6, %v71_v12  ;;  %v93_v23 = vrot.slane %v37_v6, %v92_v13  ;;  %v86_v24 = vrot.slane %v37_v6, %v85_v14  ;;  %v289_v46 = vld [vmem:[#allocation4 + $0x88] sm:$0xff]  ;;  %v290_v47 = vld [vmem:[#allocation4 + $0x90] sm:$0xff] }
  0x2d   :  { %60 = vbcast.lane.b32.xlu1 %v58_v7, 256  ;;  %46 = vbcast.lane.b32.xlu0 %v44_v8, 256  ;;  %v740_v34 = vpack.c.bf16 %v280_v32, %v279_v31  ;;  %v743_v36 = vpack.c.bf16 %v282_v35, %v281_v33  ;;  %v746_v39 = vpack.c.bf16 %v284_v38, %v283_v37  ;;  %vm201_vm14 = vcmask 1045509  }
  0x2e   :  { %735 = vmatpush3.bf16.msra.mxu0 %v734_v25  ;;  %v749_v42 = vpack.c.bf16 %v286_v41, %v285_v40  ;;  %v752_v45 = vpack.c.bf16 %v288_v44, %v287_v43  ;;  %v755_v48 = vpack.c.bf16 %v290_v47, %v289_v46  ;;  %vm203_vm15 = vcmask 1046534  }
  0x2f   :  { %736 = vmatprep.subr.bf16.mxu0 %v838_v20  ;;  %741 = vmatpush3.bf16.msra.mxu1 %v740_v34 }
  0x30   :  { %742 = vmatprep.subr.bf16.mxu1 %v838_v20 }
  0x31   :  { %67 = vbcast.lane.b32.xlu1 %v65_v9, 256  ;;  %53 = vbcast.lane.b32.xlu0 %v51_v10, 256 }
  0x32   :  { %738 = vmatpush3.bf16.msra.mxu0 %v737_v28 }
  0x33   :  { %666 = vmatprep.subr.mxu0 %v839_v29  ;;  %744 = vmatpush3.bf16.msra.mxu1 %v743_v36 }
  0x34   :  { %745 = vmatprep.subr.bf16.mxu1 %v838_v20 }
  0x35   :  { %81 = vbcast.lane.b32.xlu1 %v79_v17, 256  ;;  %74 = vbcast.lane.b32.xlu0 %v72_v18, 256 }
  0x36   :  { %667 = vmatpush3.msra.mxu0 %v184_v30 }
  0x37   :  { %763 = vmatprep.subr.bf16.mxu0 %v838_v20  ;;  %747 = vmatpush3.bf16.msra.mxu1 %v746_v39 }
  0x38   :  { %748 = vmatprep.subr.bf16.mxu1 %v838_v20 }
  0x39   :  { %95 = vbcast.lane.b32.xlu1 %v93_v23, 256  ;;  %88 = vbcast.lane.b32.xlu0 %v86_v24, 256 }
  0x3b   :  { %750 = vmatpush3.bf16.msra.mxu1 %v749_v42 }
  0x3c   :  { %751 = vmatprep.subr.bf16.mxu1 %v838_v20 }
  0x3f   :  { %753 = vmatpush3.bf16.msra.mxu1 %v752_v45 }
  0x40   :  { %754 = vmatprep.subr.bf16.mxu1 %v838_v20 }
  0x43   :  { %756 = vmatpush3.bf16.msra.mxu1 %v755_v48 }
  0x44   :  { %695 = vmatprep.subr.mxu1 %v839_v29 }
  0x9f   :  { %v61_v50 = vpop.permute.xlu1 %60  ;;  %v47_v51 = vpop.permute.xlu0 %46 }
  0xa0   :  { %vm99_vm2 = vcmp.eq.s32.totalorder %v61_v50, %v40_v49  ;;  %vm97_vm3 = vcmp.eq.s32.totalorder %v47_v51, %v40_v49 }
  0xa1   :  { %v608_v52 = vsel %vm99_vm2, 1.0, %v839_v29  ;;  %v606_v53 = vsel %vm97_vm3, 1.0, %v839_v29  ;;  %vm205_vm2 = vcmask 1047559   ;;  %vm296_vm3 = vcmask 850944  }
  0xa2   :  { %v136_v54 = vsel %vm121_vm1, %v608_v52, 0.0  ;;  %v122_v55 = vsel %vm121_vm1, %v606_v53, 0.0 }
  0xa3   :  { %v137_v56 = vrot.slane %v136_v54, 4  ;;  %v123_v57 = vrot.slane %v122_v55, 4  ;;  %v68_v58 = vpop.permute.xlu1 %67  ;;  %v54_v59 = vpop.permute.xlu0 %53 }
  0xa4   :  { %vm100_vm4 = vcmp.eq.s32.totalorder %v68_v58, %v40_v49  ;;  %vm98_vm5 = vcmp.eq.s32.totalorder %v54_v59, %v40_v49 }
  0xa5   :  { %v138_v60 = vadd.f32 %v137_v56, %v136_v54  ;;  %v124_v61 = vadd.f32 %v123_v57, %v122_v55  ;;  %v609_v62 = vsel %vm100_vm4, 1.0, %v839_v29  ;;  %v607_v63 = vsel %vm98_vm5, 1.0, %v839_v29 }
  0xa6   :  { %v143_v0 = vsel %vm121_vm1, %v609_v62, 0.0  ;;  %v129_v6 = vsel %vm121_vm1, %v607_v63, 0.0 }
  0xa7   :  { %v139_v7 = vrot.slane %v138_v60, 2  ;;  %v125_v8 = vrot.slane %v124_v61, 2  ;;  %v144_v9 = vrot.slane %v143_v0, 4  ;;  %v130_v10 = vrot.slane %v129_v6, 4  ;;  %v82_v13 = vpop.permute.xlu1 %81  ;;  %v75_v15 = vpop.permute.xlu0 %74 }
  0xa8   :  { %vm102_vm6 = vcmp.eq.s32.totalorder %v82_v13, %v40_v49  ;;  %vm101_vm7 = vcmp.eq.s32.totalorder %v75_v15, %v40_v49 }
  0xa9   :  { %v140_v16 = vadd.f32 %v139_v7, %v138_v60  ;;  %v126_v17 = vadd.f32 %v125_v8, %v124_v61  ;;  %v145_v18 = vadd.f32 %v144_v9, %v143_v0  ;;  %v131_v19 = vadd.f32 %v130_v10, %v129_v6 }
  0xaa   :  { %v611_v21 = vsel %vm102_vm6, 1.0, %v839_v29  ;;  %v610_v22 = vsel %vm101_vm7, 1.0, %v839_v29 }
  0xab   :  { %v146_v23 = vrot.slane %v145_v18, 2  ;;  %v132_v24 = vrot.slane %v131_v19, 2  ;;  %v96_v25 = vpop.permute.xlu1 %95  ;;  %v89_v26 = vpop.permute.xlu0 %88  ;;  %v157_v27 = vsel %vm121_vm1, %v611_v21, 0.0  ;;  %v150_v28 = vsel %vm121_vm1, %v610_v22, 0.0 }
  0xac   :  { %vm104_vm9 = vcmp.eq.s32.totalorder %v96_v25, %v40_v49  ;;  %vm103_vm10 = vcmp.eq.s32.totalorder %v89_v26, %v40_v49  ;;  %v141_v30 = vrot.slane %v140_v16, 1  ;;  %v127_v31 = vrot.slane %v126_v17, 1  ;;  %v403_v26 = vld [vmem:[#allocation4 + $0xb0] sm:$0xff] }
  0xad   :  { %v147_v32 = vadd.f32 %v146_v23, %v145_v18  ;;  %v133_v33 = vadd.f32 %v132_v24, %v131_v19  ;;  %v158_v34 = vrot.slane %v157_v27, 4  ;;  %v151_v35 = vrot.slane %v150_v28, 4  ;;  %v291_v19 = vld [vmem:[#allocation4 + $0x98] sm:$0xff]  ;;  %v401_v23 = vld [vmem:[#allocation4 + $0xa0] sm:$0xff]  ;;  %v402_v24 = vld [vmem:[#allocation4 + $0xa8] sm:$0xff] }
  0xae   :  { %v613_v36 = vsel %vm104_vm9, 1.0, %v839_v29  ;;  %v612_v37 = vsel %vm103_vm10, 1.0, %v839_v29  ;;  %v142_v45 = vadd.f32 %v141_v30, %v140_v16  ;;  %v128_v46 = vadd.f32 %v127_v31, %v126_v17  ;;  %696 = vmatpush3.msra.mxu1 %v291_v19  ;;  %v954_v30 = vld [vmem:[#allocation4 + $0x100] sm:$0xff] }
  0xaf   :  { %v134_v38 = vrot.slane %v133_v33, 1  ;;  %v171_v39 = vsel %vm121_vm1, %v613_v36, 0.0  ;;  %v164_v40 = vsel %vm121_vm1, %v612_v37, 0.0  ;;  %v159_v41 = vadd.f32 %v158_v34, %v157_v27  ;;  %757 = vmatprep.subr.bf16.mxu1 %v838_v20  ;;  %v404_v27 = vld [vmem:[#allocation4 + $0xb8] sm:$0xff] }
  0xb0   :  { %v152_v42 = vadd.f32 %v151_v35, %v150_v28  ;;  %v172_v43 = vrot.slane %v171_v39, 4  ;;  %v165_v44 = vrot.slane %v164_v40, 4  ;;  %v148_v47 = vrot.slane %v147_v32, 1 }
  0xb1   :  { %v135_v48 = vadd.f32 %v134_v38, %v133_v33  ;;  %v160_v49 = vrot.slane %v159_v41, 2  ;;  %v758_v25 = vpack.c.bf16 %v402_v24, %v401_v23  ;;  %v761_v28 = vpack.c.bf16 %v404_v27, %v403_v26 }
  0xb2   :  { %v153_v50 = vrot.slane %v152_v42, 2  ;;  %v173_v51 = vadd.f32 %v172_v43, %v171_v39  ;;  %v166_v52 = vadd.f32 %v165_v44, %v164_v40  ;;  %v149_v58 = vadd.f32 %v148_v47, %v147_v32 }
  0xb3   :  { %v194_v53 = vsel %vm193_vm8, %v135_v48, %v128_v46  ;;  %v161_v55 = vadd.f32 %v160_v49, %v159_v41  ;;  %v295_v31 = vrot.slane %v954_v30, %v43_v3 }
  0xb4   :  { %v196_v54 = vsel %vm195_vm11, %v142_v45, %v194_v53  ;;  %v154_v56 = vadd.f32 %v153_v50, %v152_v42  ;;  %v174_v57 = vrot.slane %v173_v51, 2  ;;  %v167_v59 = vrot.slane %v166_v52, 2 }
  0xb5   :  { %v162_v60 = vrot.slane %v161_v55, 1  ;;  %v198_v0 = vsel %vm197_vm12, %v149_v58, %v196_v54  ;;  %v399_v53 = vrot.slane %v954_v30, %v57_v2  ;;  %v514_v58 = vld [vmem:[#allocation4 + $0xc8] sm:$0xff] }
  0xb6   :  { %v155_v61 = vrot.slane %v154_v56, 1  ;;  %v175_v62 = vadd.f32 %v174_v57, %v173_v51  ;;  %v168_v63 = vadd.f32 %v167_v59, %v166_v52  ;;  %v394_v51 = vrot.slane %v954_v30, %v50_v5  ;;  %v513_v57 = vld [vmem:[#allocation4 + $0xc0] sm:$0xff] }
  0xb7   :  { %v163_v6 = vadd.f32 %v162_v60, %v161_v55  ;;  %v764_v59 = vpack.c.bf16 %v514_v58, %v513_v57  ;;  %v515_v60 = vld [vmem:[#allocation4 + $0xd0] sm:$0xff]  ;;  %v517_v5 = vld [vmem:[#allocation4 + $0xe0] sm:$0xff] }
  0xb8   :  { %v156_v7 = vadd.f32 %v155_v61, %v154_v56  ;;  %v176_v8 = vrot.slane %v175_v62, 1  ;;  %v169_v9 = vrot.slane %v168_v63, 1  ;;  %v516_v61 = vld [vmem:[#allocation4 + $0xd8] sm:$0xff] }
  0xba   :  { %v177_v10 = vadd.f32 %v176_v8, %v175_v62  ;;  %v200_v13 = vsel %vm199_vm13, %v156_v7, %v198_v0  ;;  %v170_v15 = vadd.f32 %v169_v9, %v168_v63  ;;  %v767_v62 = vpack.c.bf16 %v516_v61, %v515_v60  ;;  %v518_v63 = vld [vmem:[#allocation4 + $0xe8] sm:$0xff]  ;;  %v519_v0 = vld [vmem:[#allocation4 + $0xf0] sm:$0xff] }
  0xbb   :  { %v202_v16 = vsel %vm201_vm14, %v163_v6, %v200_v13  ;;  %v770_v2 = vpack.c.bf16 %v518_v63, %v517_v5  ;;  %v520_v6 = vld [vmem:[#allocation4 + $0xf8] sm:$0xff]  ;;  %v408_v8 = vrot.slane %v954_v30, %v64_v4 }
  0xbc   :  { %v204_v17 = vsel %vm203_vm15, %v170_v15, %v202_v16  ;;  %v773_v7 = vpack.c.bf16 %v520_v6, %v519_v0 }
  0xbd   :  { %v206_v18 = vsel %vm205_vm2, %v177_v10, %v204_v17 }
  0xbe   :  { %669 = vmatmul.mubr.msk.f32.vlgmr.msra.gmra.mrb[0].mxu0 %vm121_vm1, %v206_v18  ;;  %vm525_vm1 = vcmask 523264  }
  0xbf   :  { %727 = vmatprep.mubr.msk.f32.mxu0 %vm840_vm0, %v839_v29  ;;  %765 = vmatpush3.bf16.msra.mxu0 %v764_v59 }
  0xc0   :  { %766 = vmatprep.subr.bf16.mxu0 %v838_v20 }
  0xc3   :  { %768 = vmatpush3.bf16.msra.mxu0 %v767_v62 }
  0xc4   :  { %769 = vmatprep.subr.bf16.mxu0 %v838_v20 }
  0xc7   :  { %771 = vmatpush3.bf16.msra.mxu0 %v770_v2 }
  0xc8   :  { %772 = vmatprep.subr.bf16.mxu0 %v838_v20 }
  0xcb   :  { %774 = vmatpush3.bf16.msra.mxu0 %v773_v7 }
 0x191   :  { %v275_v21 = vpop.f32.mrb[0].mxu0 }
 0x192   :  { %v670_v22 = vpop.f32.mrb[1].mxu0  ;;  %698 = vmatmul.mubr.msk.f32.vlgmr.msra.gmra.mrb[0].mxu1 %vm296_vm3, %v275_v21 }
 0x193   :  { %708 = vmatprep.mubr.msk.f32.mxu1 %vm840_vm0, %v839_v29  ;;  %759 = vmatpush3.bf16.msra.mxu1 %v758_v25  ;;  %vm409_vm0 = vcmask 261120  }
 0x194   :  { %760 = vmatprep.subr.bf16.mxu1 %v838_v20 }
 0x197   :  { %762 = vmatpush3.bf16.msra.mxu1 %v761_v28 }
 0x265   :  { %v366_v32 = vpop.f32.mrb[0].mxu1 }
 0x266   :  { %v367_v33 = vadd.f32 %v366_v32, %v295_v31  ;;  %v699_v34 = vpop.f32.mrb[1].mxu1 }
 0x267   :  { %v506_v34 = vrot.slane %v954_v30, %v71_v12 }
 0x268   :  { %v370_v29 = vmax.f32 %v367_v33, 0.0 }
 0x26a   :  { %v371_v35 = vrot.slane %v370_v29, 4 }
 0x26c   :  { %v372_v36 = vadd.f32 %v371_v35, %v370_v29  ;;  %v511_v35 = vrot.slane %v954_v30, %v78_v11 }
 0x26e   :  { %v373_v37 = vrot.slane %v372_v36, 2 }
 0x270   :  { %v374_v38 = vadd.f32 %v373_v37, %v372_v36 }
 0x272   :  { %v375_v39 = vrot.slane %v374_v38, 1 }
 0x274   :  { %v376_v40 = vadd.f32 %v375_v39, %v374_v38  ;;  %v524_v39 = vrot.slane %v954_v30, %v85_v14 }
 0x276   :  { %v378_v41 = vmul.f32 0.125, %v376_v40 }
 0x278   :  { %v379_v42 = vsub.f32 %v370_v29, %v378_v41 }
 0x27a   :  { %v380_v43 = vmul.f32 %v379_v42, %v379_v42 }
 0x27c   :  { %v381_v44 = vrot.slane %v380_v43, 4 }
 0x27e   :  { %v382_v45 = vadd.f32 %v381_v44, %v380_v43 }
 0x280   :  { %v383_v46 = vrot.slane %v382_v45, 2 }
 0x282   :  { %v384_v47 = vadd.f32 %v383_v46, %v382_v45 }
 0x284   :  { %v385_v48 = vrot.slane %v384_v47, 1 }
 0x286   :  { %v386_v49 = vadd.f32 %v385_v48, %v384_v47 }
 0x288   :  { %v387_v3 = vmul.f32 0.125, %v386_v49 }
 0x28a   :  { %v388_v50 = vadd.f32 1e-05, %v387_v3 }
 0x28c   :  { %782 = vrsqrt.f32 %v388_v50 }
 0x296   :  { %v783_v52 = vpop.eup %782 }
 0x297   :  { %v390_v54 = vmul.f32 %v783_v52, %v379_v42 }
 0x299   :  { %v395_v55 = vmul.f32 %v394_v51, %v390_v54 }
 0x29b   :  { %v400_v56 = vadd.f32 %v399_v53, %v395_v55 }
 0x29d   :  { %709 = vmatmul.mubr.msk.f32.vlgmr.msra.gmra.mrb[2].mxu1 %vm409_vm0, %v400_v56 }
 0x370   :  { %v479_v9 = vpop.f32.mrb[2].mxu1 }
 0x371   :  { %v480_v10 = vadd.f32 %v479_v9, %v408_v8  ;;  %v710_v13 = vpop.f32.mrb[3].mxu1 }
 0x373   :  { %v483_v15 = vmax.f32 %v480_v10, 0.0 }
 0x375   :  { %v484_v16 = vrot.slane %v483_v15, 4 }
 0x377   :  { %v485_v17 = vadd.f32 %v484_v16, %v483_v15 }
 0x379   :  { %v486_v18 = vrot.slane %v485_v17, 2 }
 0x37b   :  { %v487_v19 = vadd.f32 %v486_v18, %v485_v17 }
 0x37d   :  { %v488_v21 = vrot.slane %v487_v19, 1 }
 0x37f   :  { %v489_v22 = vadd.f32 %v488_v21, %v487_v19 }
 0x381   :  { %v490_v23 = vmul.f32 0.125, %v489_v22 }
 0x383   :  { %v491_v20 = vsub.f32 %v483_v15, %v490_v23 }
 0x385   :  { %v492_v24 = vmul.f32 %v491_v20, %v491_v20 }
 0x387   :  { %v493_v25 = vrot.slane %v492_v24, 4 }
 0x389   :  { %v494_v26 = vadd.f32 %v493_v25, %v492_v24 }
 0x38b   :  { %v495_v27 = vrot.slane %v494_v26, 2 }
 0x38d   :  { %v496_v28 = vadd.f32 %v495_v27, %v494_v26 }
 0x38f   :  { %v497_v31 = vrot.slane %v496_v28, 1 }
 0x391   :  { %v498_v32 = vadd.f32 %v497_v31, %v496_v28 }
 0x393   :  { %v499_v4 = vmul.f32 0.125, %v498_v32 }
 0x395   :  { %v500_v33 = vadd.f32 1e-05, %v499_v4 }
 0x397   :  { %784 = vrsqrt.f32 %v500_v33 }
 0x3a1   :  { %v785_v29 = vpop.eup %784 }
 0x3a2   :  { %v502_v36 = vmul.f32 %v785_v29, %v491_v20 }
 0x3a4   :  { %v507_v37 = vmul.f32 %v506_v34, %v502_v36 }
 0x3a6   :  { %v512_v38 = vadd.f32 %v511_v35, %v507_v37 }
 0x3a8   :  { %728 = vmatmul.mubr.msk.f32.vlgmr.msra.gmra.mrb[2].mxu0 %vm525_vm1, %v512_v38 }
 0x47b   :  { %v595_v40 = vpop.f32.mrb[2].mxu0 }
 0x47c   :  { %v596_v41 = vadd.f32 %v595_v40, %v524_v39  ;;  %v729_v42 = vpop.f32.mrb[3].mxu0 }
 0x47e   :  { %599 = vst [vmem:[%s985_s2] sm:$0xff] %v596_v41 }
 0x47f   :  { %604 = vsyncpa [#allocation3], 1 }
 0x480   :  { %605 = vsyncpa [#allocation5], 1 }

</bundles_post_ra>
